<compile_context>
chip_gen: v7x
topology: tpu7x:2x2x1
jax: 0.10.0
libtpu: 0.0.40
codegen_flags: <defaults>
</compile_context>

<pallas_src>
import math
import jax
import jax.numpy as jnp
from jax import lax
from jax.experimental import pallas as pl
from jax.experimental.pallas import tpu as pltpu

_EPS = 1e-5
# 2-D dot_general dimension numbers.
_TN = (((0,), (0,)), ((), ()))   # contract dim0 of both:  lhs^T @ rhs
_NT = (((1,), (1,)), ((), ()))   # contract dim1 of both:  lhs @ rhs^T


def _nonlocal_kernel(x_ref, wq_ref, bq_ref, wk_ref, bk_ref, wv_ref, bv_ref,
                     o_ref):
    x = x_ref[0]                                       # (C, S), S on lanes
    c = x.shape[0]

    # InstanceNorm3d (no affine): per-channel stats over spatial S (lane axis).
    mean = jnp.mean(x, axis=-1, keepdims=True)
    xc = x - mean
    var = jnp.mean(xc * xc, axis=-1, keepdims=True)
    h = xc * lax.rsqrt(var + _EPS)

    # 1x1x1 convolutions: (C, C) @ (C, S) + bias -> lane-dense (C, S) tiles.
    q = jnp.dot(wq_ref[...], h, preferred_element_type=jnp.float32) + bq_ref[...]
    k = jnp.dot(wk_ref[...], h, preferred_element_type=jnp.float32) + bk_ref[...]
    v = jnp.dot(wv_ref[...], h, preferred_element_type=jnp.float32) + bv_ref[...]

    # scores[i, j] = sum_c q[c, i] * k[c, j]  ->  (S, S)
    scores = lax.dot_general(q, k, _TN, preferred_element_type=jnp.float32)
    scores = scores * (float(c) ** -0.5)

    # softmax over j (lane axis).
    m = jnp.max(scores, axis=-1, keepdims=True)
    p = jnp.exp(scores - m)
    attn = p * pl.reciprocal(jnp.sum(p, axis=-1, keepdims=True), approx=False)

    # A[c, i] = sum_j v[c, j] * attn[i, j]   ->  (C, S), lane-dense
    a = lax.dot_general(v, attn, _NT, preferred_element_type=jnp.float32)

    o_ref[0] = x + a                                   # residual connection


def nonlocal_block_3d(x, params):
    """x: (B, C, H, W, Z) float32; params: q/k/v weights (C, C) and biases (C,)."""
    B, C, H, W, Z = x.shape
    S = H * W * Z
    xr = x.reshape(B, C, S)                            # contiguous, no transpose

    wspec = pl.BlockSpec((C, C), lambda b: (0, 0))
    bspec = pl.BlockSpec((C, 1), lambda b: (0, 0))
    out = pl.pallas_call(
        _nonlocal_kernel,
        out_shape=jax.ShapeDtypeStruct((B, C, S), jnp.float32),
        grid=(B,),
        in_specs=[pl.BlockSpec((1, C, S), lambda b: (b, 0, 0)),
                  wspec, bspec, wspec, bspec, wspec, bspec],
        out_specs=pl.BlockSpec((1, C, S), lambda b: (b, 0, 0)),
        compiler_params=pltpu.CompilerParams(
            dimension_semantics=("parallel",)),
    )(xr,
      params['q_w'], params['q_b'].reshape(C, 1),
      params['k_w'], params['k_b'].reshape(C, 1),
      params['v_w'], params['v_b'].reshape(C, 1))
    return out.reshape(B, C, H, W, Z)


def nonlocal_block_3d_ref(x, params):
    """Pure-JAX reference (high precision) mirroring the PyTorch forward."""
    B, C, H, W, Z = x.shape
    S = H * W * Z
    hi = lax.Precision.HIGHEST
    xr = x.reshape(B, C, S)
    mean = jnp.mean(xr, axis=-1, keepdims=True)
    var = jnp.mean((xr - mean) ** 2, axis=-1, keepdims=True)
    h = (xr - mean) * lax.rsqrt(var + _EPS)

    def proj(w, b):
        return jnp.einsum('oc,bcs->bos', w, h, precision=hi) + b[None, :, None]

    q = proj(params['q_w'], params['q_b'])
    k = proj(params['k_w'], params['k_b'])
    v = proj(params['v_w'], params['v_b'])
    attn = jnp.einsum('bci,bcj->bij', q, k, precision=hi) * (float(C) ** -0.5)
    attn = jax.nn.softmax(attn, axis=-1)
    a = jnp.einsum('bcj,bij->bci', v, attn, precision=hi)
    return (xr + a).reshape(B, C, H, W, Z)


if __name__ == "__main__":
    key = jax.random.PRNGKey(0)
    B, C, H, W, Z = 2, 8, 4, 4, 8          # S = H*W*Z = 128 -> one full lane row
    groups = 2                              # groups!=None -> InstanceNorm3d path
    assert C % groups == 0

    kx, kp = jax.random.split(key)
    keys = jax.random.split(kp, 6)
    bound = 1.0 / math.sqrt(C)             # PyTorch Conv3d default init (fan_in=C)
    params = {
        'q_w': jax.random.uniform(keys[0], (C, C), jnp.float32, -bound, bound),
        'q_b': jax.random.uniform(keys[1], (C,), jnp.float32, -bound, bound),
        'k_w': jax.random.uniform(keys[2], (C, C), jnp.float32, -bound, bound),
        'k_b': jax.random.uniform(keys[3], (C,), jnp.float32, -bound, bound),
        'v_w': jax.random.uniform(keys[4], (C, C), jnp.float32, -bound, bound),
        'v_b': jax.random.uniform(keys[5], (C,), jnp.float32, -bound, bound),
    }
    # TODO(synk): proj_out exists in the PyTorch module but is never applied in
    # its forward(), so it is intentionally omitted here.

    x = jax.random.normal(kx, (B, C, H, W, Z), jnp.float32)

    out = nonlocal_block_3d(x, params)
    out = jax.block_until_ready(out)

    assert out.shape == x.shape, out.shape
    assert bool(jnp.all(jnp.isfinite(out)))

    ref = nonlocal_block_3d_ref(x, params)
    max_err = float(jnp.max(jnp.abs(out - ref)))
    assert max_err < 5e-2, f"max abs err vs JAX reference: {max_err}"

    print("KERNEL_OK")
</pallas_src>

<mosaic_0001>
module attributes {stable_mosaic.version = 11 : i64} {
  func.func @_nonlocal_kernel(%arg0: i32, %arg1: memref<1x8x128xf32, #tpu.memory_space<vmem>>, %arg2: memref<8x8xf32, #tpu.memory_space<vmem>>, %arg3: memref<8x1xf32, #tpu.memory_space<vmem>>, %arg4: memref<8x8xf32, #tpu.memory_space<vmem>>, %arg5: memref<8x1xf32, #tpu.memory_space<vmem>>, %arg6: memref<8x8xf32, #tpu.memory_space<vmem>>, %arg7: memref<8x1xf32, #tpu.memory_space<vmem>>, %arg8: memref<1x8x128xf32, #tpu.memory_space<vmem>>) attributes {dimension_semantics = [#tpu.dimension_semantics<parallel>], iteration_bounds = array<i64: 2>, scalar_prefetch = 0 : i64, scratch_operands = 0 : i64, tpu.core_type = #tpu.core_type<tc>, window_params = [{transform_indices = @transform_0, window_bounds = array<i64: 1, 8, 128>}, {pipeline_mode = #tpu.pipeline_mode<synchronous>, transform_indices = @transform_1, window_bounds = array<i64: 8, 8>}, {pipeline_mode = #tpu.pipeline_mode<synchronous>, transform_indices = @transform_2, window_bounds = array<i64: 8, 1>}, {pipeline_mode = #tpu.pipeline_mode<synchronous>, transform_indices = @transform_3, window_bounds = array<i64: 8, 8>}, {pipeline_mode = #tpu.pipeline_mode<synchronous>, transform_indices = @transform_4, window_bounds = array<i64: 8, 1>}, {pipeline_mode = #tpu.pipeline_mode<synchronous>, transform_indices = @transform_5, window_bounds = array<i64: 8, 8>}, {pipeline_mode = #tpu.pipeline_mode<synchronous>, transform_indices = @transform_6, window_bounds = array<i64: 8, 1>}, {transform_indices = @transform_7, window_bounds = array<i64: 1, 8, 128>}]} {
    %c0 = arith.constant 0 : index
    %c0_0 = arith.constant 0 : index
    %c0_1 = arith.constant 0 : index
    %0 = vector.load %arg1[%c0, %c0_0, %c0_1] : memref<1x8x128xf32, #tpu.memory_space<vmem>>, vector<1x8x128xf32>
    %1 = vector.shape_cast %0 : vector<1x8x128xf32> to vector<8x128xf32>
    %cst = arith.constant dense<0.000000e+00> : vector<8xf32>
    %2 = vector.multi_reduction <add>, %1, %cst [1] : vector<8x128xf32> to vector<8xf32>
    %3 = vector.shape_cast %2 : vector<8xf32> to vector<8x1xf32>
    %cst_2 = arith.constant 1.280000e+02 : f32
    %4 = vector.broadcast %cst_2 : f32 to vector<8x1xf32>
    %5 = arith.divf %3, %4 : vector<8x1xf32>
    %6 = vector.broadcast %5 : vector<8x1xf32> to vector<8x128xf32>
    %7 = arith.subf %1, %6 : vector<8x128xf32>
    %8 = arith.mulf %7, %7 : vector<8x128xf32>
    %cst_3 = arith.constant dense<0.000000e+00> : vector<8xf32>
    %9 = vector.multi_reduction <add>, %8, %cst_3 [1] : vector<8x128xf32> to vector<8xf32>
    %10 = vector.shape_cast %9 : vector<8xf32> to vector<8x1xf32>
    %cst_4 = arith.constant 1.280000e+02 : f32
    %11 = vector.broadcast %cst_4 : f32 to vector<8x1xf32>
    %12 = arith.divf %10, %11 : vector<8x1xf32>
    %cst_5 = arith.constant 9.99999974E-6 : f32
    %13 = vector.broadcast %cst_5 : f32 to vector<8x1xf32>
    %14 = arith.addf %12, %13 : vector<8x1xf32>
    %15 = math.rsqrt %14 : vector<8x1xf32>
    %16 = vector.broadcast %15 : vector<8x1xf32> to vector<8x128xf32>
    %17 = arith.mulf %7, %16 : vector<8x128xf32>
    %c0_6 = arith.constant 0 : index
    %c0_7 = arith.constant 0 : index
    %18 = vector.load %arg2[%c0_6, %c0_7] : memref<8x8xf32, #tpu.memory_space<vmem>>, vector<8x8xf32>
    %cst_8 = arith.constant dense<0.000000e+00> : vector<8x128xf32>
    %19 = tpu.matmul %18, %17, %cst_8 {dimension_numbers = #tpu.dot_dimension_numbers<[1], [0], [0], [1], [0, 0, 1, 1], [], []>} : vector<8x8xf32>, vector<8x128xf32>, vector<8x128xf32> -> vector<8x128xf32>
    %c0_9 = arith.constant 0 : index
    %c0_10 = arith.constant 0 : index
    %20 = vector.load %arg3[%c0_9, %c0_10] : memref<8x1xf32, #tpu.memory_space<vmem>>, vector<8x1xf32>
    %21 = vector.broadcast %20 : vector<8x1xf32> to vector<8x128xf32>
    %22 = arith.addf %19, %21 : vector<8x128xf32>
    %c0_11 = arith.constant 0 : index
    %c0_12 = arith.constant 0 : index
    %23 = vector.load %arg4[%c0_11, %c0_12] : memref<8x8xf32, #tpu.memory_space<vmem>>, vector<8x8xf32>
    %cst_13 = arith.constant dense<0.000000e+00> : vector<8x128xf32>
    %24 = tpu.matmul %23, %17, %cst_13 {dimension_numbers = #tpu.dot_dimension_numbers<[1], [0], [0], [1], [0, 0, 1, 1], [], []>} : vector<8x8xf32>, vector<8x128xf32>, vector<8x128xf32> -> vector<8x128xf32>
    %c0_14 = arith.constant 0 : index
    %c0_15 = arith.constant 0 : index
    %25 = vector.load %arg5[%c0_14, %c0_15] : memref<8x1xf32, #tpu.memory_space<vmem>>, vector<8x1xf32>
    %26 = vector.broadcast %25 : vector<8x1xf32> to vector<8x128xf32>
    %27 = arith.addf %24, %26 : vector<8x128xf32>
    %c0_16 = arith.constant 0 : index
    %c0_17 = arith.constant 0 : index
    %28 = vector.load %arg6[%c0_16, %c0_17] : memref<8x8xf32, #tpu.memory_space<vmem>>, vector<8x8xf32>
    %cst_18 = arith.constant dense<0.000000e+00> : vector<8x128xf32>
    %29 = tpu.matmul %28, %17, %cst_18 {dimension_numbers = #tpu.dot_dimension_numbers<[1], [0], [0], [1], [0, 0, 1, 1], [], []>} : vector<8x8xf32>, vector<8x128xf32>, vector<8x128xf32> -> vector<8x128xf32>
    %c0_19 = arith.constant 0 : index
    %c0_20 = arith.constant 0 : index
    %30 = vector.load %arg7[%c0_19, %c0_20] : memref<8x1xf32, #tpu.memory_space<vmem>>, vector<8x1xf32>
    %31 = vector.broadcast %30 : vector<8x1xf32> to vector<8x128xf32>
    %32 = arith.addf %29, %31 : vector<8x128xf32>
    %cst_21 = arith.constant dense<0.000000e+00> : vector<128x128xf32>
    %33 = tpu.matmul %22, %27, %cst_21 {dimension_numbers = #tpu.dot_dimension_numbers<[0], [0], [1], [1], [0, 1, 1, 1], [], []>} : vector<8x128xf32>, vector<8x128xf32>, vector<128x128xf32> -> vector<128x128xf32>
    %cst_22 = arith.constant 0.353553385 : f32
    %34 = vector.broadcast %cst_22 : f32 to vector<128x128xf32>
    %35 = arith.mulf %33, %34 : vector<128x128xf32>
    %cst_23 = arith.constant dense<0xFF800000> : vector<128xf32>
    %36 = vector.multi_reduction <maximumf>, %35, %cst_23 [1] : vector<128x128xf32> to vector<128xf32>
    %37 = vector.shape_cast %36 : vector<128xf32> to vector<128x1xf32>
    %38 = vector.broadcast %37 : vector<128x1xf32> to vector<128x128xf32>
    %39 = arith.subf %35, %38 : vector<128x128xf32>
    %40 = math.exp %39 : vector<128x128xf32>
    %cst_24 = arith.constant dense<0.000000e+00> : vector<128xf32>
    %41 = vector.multi_reduction <add>, %40, %cst_24 [1] : vector<128x128xf32> to vector<128xf32>
    %42 = vector.shape_cast %41 : vector<128xf32> to vector<128x1xf32>
    %43 = tpu.reciprocal %42 : vector<128x1xf32> -> vector<128x1xf32>
    %44 = vector.broadcast %43 : vector<128x1xf32> to vector<128x128xf32>
    %45 = arith.mulf %40, %44 : vector<128x128xf32>
    %cst_25 = arith.constant dense<0.000000e+00> : vector<8x128xf32>
    %46 = tpu.matmul %32, %45, %cst_25 {dimension_numbers = #tpu.dot_dimension_numbers<[1], [1], [0], [0], [0, 0, 1, 0], [], []>} : vector<8x128xf32>, vector<128x128xf32>, vector<8x128xf32> -> vector<8x128xf32>
    %47 = arith.addf %1, %46 : vector<8x128xf32>
    %c0_26 = arith.constant 0 : index
    %c0_27 = arith.constant 0 : index
    %c0_28 = arith.constant 0 : index
    %48 = vector.load %arg8[%c0_26, %c0_27, %c0_28] : memref<1x8x128xf32, #tpu.memory_space<vmem>>, vector<1x8x128xf32>
    %49 = vector.shape_cast %48 : vector<1x8x128xf32> to vector<8x128xf32>
    %50 = vector.shape_cast %47 : vector<8x128xf32> to vector<1x8x128xf32>
    tpu.vector_store %arg8[%c0_26, %c0_27, %c0_28], %50 {strides = array<i32>} : memref<1x8x128xf32, #tpu.memory_space<vmem>>, vector<1x8x128xf32>,
    return
  }
  func.func @transform_0(%arg0: i32) -> (i32, i32, i32) {
    %c0_i32 = arith.constant 0 : i32
    %c0_i32_0 = arith.constant 0 : i32
    %c0_i32_1 = arith.constant 0 : i32
    return %arg0, %c0_i32, %c0_i32_0 : i32, i32, i32
  }
  func.func @transform_1(%arg0: i32) -> (i32, i32) {
    %c0_i32 = arith.constant 0 : i32
    %c0_i32_0 = arith.constant 0 : i32
    %c0_i32_1 = arith.constant 0 : i32
    return %c0_i32, %c0_i32_0 : i32, i32
  }
  func.func @transform_2(%arg0: i32) -> (i32, i32) {
    %c0_i32 = arith.constant 0 : i32
    %c0_i32_0 = arith.constant 0 : i32
    %c0_i32_1 = arith.constant 0 : i32
    return %c0_i32, %c0_i32_0 : i32, i32
  }
  func.func @transform_3(%arg0: i32) -> (i32, i32) {
    %c0_i32 = arith.constant 0 : i32
    %c0_i32_0 = arith.constant 0 : i32
    %c0_i32_1 = arith.constant 0 : i32
    return %c0_i32, %c0_i32_0 : i32, i32
  }
  func.func @transform_4(%arg0: i32) -> (i32, i32) {
    %c0_i32 = arith.constant 0 : i32
    %c0_i32_0 = arith.constant 0 : i32
    %c0_i32_1 = arith.constant 0 : i32
    return %c0_i32, %c0_i32_0 : i32, i32
  }
  func.func @transform_5(%arg0: i32) -> (i32, i32) {
    %c0_i32 = arith.constant 0 : i32
    %c0_i32_0 = arith.constant 0 : i32
    %c0_i32_1 = arith.constant 0 : i32
    return %c0_i32, %c0_i32_0 : i32, i32
  }
  func.func @transform_6(%arg0: i32) -> (i32, i32) {
    %c0_i32 = arith.constant 0 : i32
    %c0_i32_0 = arith.constant 0 : i32
    %c0_i32_1 = arith.constant 0 : i32
    return %c0_i32, %c0_i32_0 : i32, i32
  }
  func.func @transform_7(%arg0: i32) -> (i32, i32, i32) {
    %c0_i32 = arith.constant 0 : i32
    %c0_i32_0 = arith.constant 0 : i32
    %c0_i32_1 = arith.constant 0 : i32
    return %arg0, %c0_i32, %c0_i32_0 : i32, i32, i32
  }
}

</mosaic_0001>

<bundles_post_ra>
// kernel: tpu_custom_call.1
= control target key start
LH: loop header
LB: loop body
LE: loop exit
PB: predicated region body
PF: predicated region fallthrough
CT: control target
= control target key end

     0   :  { %12 = vsyncpa [#allocation3], 0  ;;  %s1704_s0 = inlined_call_operand.vmem [shape: f32[2,8,128], index: 0, kind: input, shape index: {}]   ;;  %s1705_s1 = inlined_call_operand.vmem [shape: f32[8,8], index: 1, kind: input, shape index: {}]   ;;  %s1706_s2 = inlined_call_operand.vmem [shape: f32[8,1], index: 2, kind: input, shape index: {}]   ;;  %s1707_s3 = inlined_call_operand.vmem [shape: f32[8,8], index: 3, kind: input, shape index: {}]   ;;  %s1708_s4 = inlined_call_operand.vmem [shape: f32[8,1], index: 4, kind: input, shape index: {}]   ;;  %s1709_s5 = inlined_call_operand.vmem [shape: f32[8,8], index: 5, kind: input, shape index: {}]   ;;  %s1710_s6 = inlined_call_operand.vmem [shape: f32[8,1], index: 6, kind: input, shape index: {}]   ;;  %s1711_s7 = inlined_call_operand.hbm [shape: f32[2,8,128], index: 7, kind: output, shape index: {}]  }
   0x1   :  { %14 = vsyncpa [#allocation3 + $0x1], 0  ;;  %s1447_s24 = smov 0   ;;  %s1449_s25 = smov 0  }
   0x2   :  { %s1451_s26 = smov 0   ;;  %s1453_s27 = smov 0  }
   0x3 LB: > { %s1468_s28 = sadd.s32 4294967295, %s1400_s27   ;;  %s1058_s29 = sadd.s32 4294967294, %s1400_s27   ;;  %s1400_s27 = sphi %s1453_s27, %s1717_s27   ;;  %s1396_s26 = sphi %s1451_s26, %s1716_s26   ;;  %s1392_s25 = sphi %s1449_s25, %s1715_s25   ;;  %s1388_s24 = sphi %s1447_s24, %s1714_s24  }
   0x4   : > { %s1472_s30 = sadd.s32 1, %s1400_s27   ;;  %s179_s8 = sadd.s32 1, %s1396_s26 }
   0x5   : > { %s176_s9 = ssub.s32 %s1400_s27, %s1472_s30  ;;  %p189_p0 = scmp.ne.s32.totalorder %s1396_s26, %s1392_s25 }
   0x6   : > { %p177_p1 = scmp.eq.s32.totalorder %s176_s9, 0  ;;  %p190_p2 = scmp.eq.s32.totalorder %s1468_s28, 1 }
   0x7   : > { %p195_p3 = scmp.ne.s32.totalorder %s1392_s25, %s1388_s24  ;;  %p196_p4 = scmp.eq.s32.totalorder %s1058_s29, 1 }
   0x8   : > { %s1483_s10 = scalar_select %p177_p1, %s1396_s26, %s179_s8  }
   0x9   : > { %p1485_p5 = por %p190_p2, %p189_p0  ;;  %p1489_p6 = por %p196_p4, %p195_p3 }
   0xa   : > { %p1061_p7 = scmp.ge.s32.totalorder %s1400_s27, 1  ;;  %p239_p8 = scmp.lt.s32.totalorder %s1400_s27, 3 }
   0xc   : > { %p240_p9 = pnand %p1061_p7, %p239_p8 }
   0xd   : > { %p270_p10 = scmp.lt.s32.totalorder (!%p240_p9), %s1468_s28, 1  ;;  %v1402_v5 = vmov (!%p240_p9), 0.0   ;;  %vm1403_vm0 = vmmov (!%p240_p9), 0   ;;  %v288_v6 = vld [vmem:[%s1706_s2] sm:$0xff] (!%p240_p9)  ;;  %v1404_v7 = vmov (!%p240_p9), 0   ;;  %vm294_vm1 = vcmask (!%p240_p9), 64512  }
   0xe   : > { %243 = sbr.rel (%p240_p9) target bundleno = 1509 (0x5e5), region = 48  ;;  %1127 = vmatprep.subr.mxu1 (!%p240_p9), %v1402_v5  ;;  %1129 = vmatprep.mubr.msk.f32.mxu1 (!%p240_p9), %vm1403_vm0, %v1402_v5  ;;  %v369_v8 = vld [vmem:[%s1708_s4] sm:$0xff] (!%p240_p9)  ;;  %s267_s16 = sand.u32 (!%p240_p9), 1, %s1392_s25  }
   0xf   : > { %1200 = vmatprep.mubr.msk.f32.mxu0 (!%p240_p9), %vm1403_vm0, %v1402_v5  ;;  %1270 = vset.pattern.permute.xlu1 (!%p240_p9), %v1404_v7  ;;  %v287_v14 = vld [vmem:[%s1705_s1] sm:$0xff] (!%p240_p9)  ;;  %s1084_s18 = sshll.u32 (!%p240_p9), %s1468_s28, 7  ;;  %s986_s29 = scalar_lea.sflag (!%p240_p9), [#allocation3], %s267_s16 }
  0x10   : > { %291 = vperm.xlu1 (!%p240_p9), %1270, %v288_v6   ;;  %v368_v15 = vld [vmem:[%s1707_s3] sm:$0xff] (!%p240_p9)  ;;  %s1662_s23 = scalar_lea.hbm (!%p240_p9), %s1711_s7, %s1084_s18 }
  0x11   : > { %v448_v16 = vld [vmem:[%s1709_s5] sm:$0xff] (!%p240_p9) }
  0x14   : > { %372 = vperm.xlu1 (!%p240_p9), %1270, %v369_v8  }
  0x15   : > { %s271_s13 = scalar_select %p270_p10, %s1468_s28, 1 }
  0x16   : > { %s1406_s28 = smov [#allocation2]  }
  0x17   : > { %s1063_s14 = sshll.u32 %s271_s13, 3  ;;  %s1342_s9 = sshll.u32 %s1406_s28, 4  ;;  %s1343_s9 = int_to_ptr.vmem [resolvable:$false] %s1342_s9 }
  0x18   : > { %s273_s17 = scalar_lea.vmem %s1704_s0, %s1063_s14  ;;  %s1344_s13 = scalar_lea.vmem %s1343_s9, 256 }
  0x19   : > { %v1500_v0 = vld [vmem:[%s273_s17] sm:$0xff]  ;;  %s1062_s17 = sshll.u32 %s267_s16, 3 }
  0x1a   : > { %275 = vadd.xlane.f32.xlu0 %v1500_v0  ;;  %s269_s19 = scalar_lea.vmem [#allocation2], %s1062_s17 }
  0x1b   : > { %s999_s20 = sshll.u32 %s269_s19, 4  ;;  %s1664_s20 = int_to_ptr.vmem [resolvable:$true] %s999_s20 }
  0x1c   : > { %s1338_s8 = scalar_lea.vmem %s1664_s20, 128  ;;  %p1345_p0 = scmp.lt.s32.totalorder %s1664_s20, %s1343_s9 }
  0x1d   : > { %p1339_p11 = scmp.ne.s32.totalorder %s1664_s20, %s1338_s8  ;;  %p1346_p1 = scmp.lt.s32.totalorder %s1344_s13, %s1338_s8 }
  0x1f   : > { %p1340_p12 = pnand %p1339_p11, %p1485_p5  ;;  %p1347_p2 = por %p1346_p1, %p1345_p0 }
  0x21   : > { %p1341_p13 = pneg %p1340_p12 }
  0x23   : > { %p1348_p3 = pnand %p1347_p2, %p1341_p13 }
  0x8f   : > { %v292_v17 = vpop.permute.xlu1 %291 }
  0x93   : > { %v373_v21 = vpop.permute.xlu1 %372 }
  0xa7   : > { %v276_v1 = vpop.xlane.xlu0 %275 }
  0xa8   : > { %v278_v2 = vmul.f32 0.0078125, %v276_v1 }
  0xaa   : > { %v279_v3 = vsub.f32 %v1500_v0, %v278_v2 }
  0xac   : > { %v280_v4 = vmul.f32 %v279_v3, %v279_v3 }
  0xae   : > { %281 = vadd.xlane.f32.xlu0 %v280_v4 }
 0x13b   : > { %v282_v9 = vpop.xlane.xlu0 %281 }
 0x13c   : > { %v283_v10 = vmul.f32 0.0078125, %v282_v9 }
 0x13e   : > { %v284_v11 = vadd.f32 1e-05, %v283_v10 }
 0x140   : > { %1272 = vrsqrt.f32 %v284_v11 }
 0x14a   : > { %v1273_v12 = vpop.eup %1272 }
 0x14b   : > { %v286_v13 = vmul.f32 %v1273_v12, %v279_v3 }
 0x14d   : > { %1128 = vmatpush3.msra.mxu1 %v286_v13 }
 0x14e   : > { %1130 = vmatmul.mubr.msk.f32.vlgmr.msra.gmra.mrb[0].mxu1 %vm294_vm1, %v287_v14  ;;  %1132 = vmatprep.subr.mxu1 %v1402_v5 }
 0x14f   : > { %1133 = vmatpush3.msra.mxu1 %v286_v13  ;;  %1134 = vmatprep.mubr.msk.f32.mxu1 %vm1403_vm0, %v1402_v5 }
 0x150   : > { %1137 = vmatprep.subr.mxu1 %v1402_v5 }
 0x152   : > { %1135 = vmatmul.mubr.msk.f32.vlgmr.msra.gmra.mrb[2].mxu1 %vm294_vm1, %v368_v15 }
 0x153   : > { %1138 = vmatpush3.msra.mxu1 %v286_v13  ;;  %1139 = vmatprep.mubr.msk.f32.mxu1 %vm1403_vm0, %v1402_v5 }
 0x156   : > { %1140 = vmatmul.mubr.msk.f32.vlgmr.msra.gmra.mrb[4].mxu1 %vm294_vm1, %v448_v16 }
 0x221   : > { %v364_v18 = vpop.f32.mrb[0].mxu1 }
 0x222   : > { %v365_v19 = vadd.f32 %v364_v18, %v292_v17  ;;  %v1131_v20 = vpop.f32.mrb[1].mxu1 }
 0x224   : > { %528 = vxpose.xlu0.b32.start.end [1/1] (short) %v365_v19, 128 }
 0x225   : > { %v444_v22 = vpop.f32.mrb[2].mxu1 }
 0x226   : > { %v445_v23 = vadd.f32 %v444_v22, %v373_v21  ;;  %v1136_v24 = vpop.f32.mrb[3].mxu1 }
 0x228   : > { %1142 = vmatprep.subr.mxu1 %v445_v23 }
 0x229   : > { %1143 = vmatpush3.msra.mxu1 %v445_v23  ;;  %v1526_v25 = vpop.f32.mrb[4].mxu1 }
 0x22a   : > { %v1141_v26 = vpop.f32.mrb[5].mxu1 }
 0x24d   : > { %1271 = vset.pattern.permute.xlu0 %v1404_v7 }
 0x2a4   : > { %v544_v27 = vpop.trf.xlu0 }
 0x2a5   : > { %1144 = vmatprep.mubr.msk.f32.mxu1 %vm294_vm1, %v544_v27 }
 0x2a8   : > { %v545_v28 = vpop.trf.xlu0 }
 0x2a9   : > { %1145 = vmatmul.mubr.msk.f32.vlgmr.msra.gmra.mrb[6].mxu1 %vm294_vm1, %v545_v28 }
 0x2ac   : > { %v546_v29 = vpop.trf.xlu0 }
 0x2ad   : > { %1147 = vmatprep.mubr.msk.f32.mxu1 %vm294_vm1, %v546_v29 }
 0x2b0   : > { %v547_v30 = vpop.trf.xlu0 }
 0x2b1   : > { %1148 = vmatmul.mubr.msk.f32.gmra.mrb[8].mxu1 %vm294_vm1, %v547_v30 }
 0x2b4   : > { %v548_v31 = vpop.trf.xlu0 }
 0x2b5   : > { %1150 = vmatprep.mubr.msk.f32.mxu1 %vm294_vm1, %v548_v31 }
 0x2b8   : > { %v549_v32 = vpop.trf.xlu0 }
 0x2b9   : > { %1151 = vmatmul.mubr.msk.f32.gmra.mrb[10].mxu1 %vm294_vm1, %v549_v32 }
 0x2bc   : > { %v550_v33 = vpop.trf.xlu0 }
 0x2bd   : > { %1153 = vmatprep.mubr.msk.f32.mxu1 %vm294_vm1, %v550_v33 }
 0x2c0   : > { %v551_v34 = vpop.trf.xlu0 }
 0x2c1   : > { %1154 = vmatmul.mubr.msk.f32.gmra.mrb[12].mxu1 %vm294_vm1, %v551_v34 }
 0x2c4   : > { %v552_v35 = vpop.trf.xlu0 }
 0x2c5   : > { %1156 = vmatprep.mubr.msk.f32.mxu1 %vm294_vm1, %v552_v35 }
 0x2c8   : > { %v553_v36 = vpop.trf.xlu0 }
 0x2c9   : > { %1157 = vmatmul.mubr.msk.f32.gmra.mrb[14].mxu1 %vm294_vm1, %v553_v36 }
 0x2cc   : > { %v554_v37 = vpop.trf.xlu0 }
 0x2cd   : > { %1159 = vmatprep.mubr.msk.f32.mxu1 %vm294_vm1, %v554_v37 }
 0x2d0   : > { %v555_v38 = vpop.trf.xlu0 }
 0x2d1   : > { %1160 = vmatmul.mubr.msk.f32.gmra.mrb[16].mxu1 %vm294_vm1, %v555_v38 }
 0x2d4   : > { %v556_v39 = vpop.trf.xlu0 }
 0x2d5   : > { %1162 = vmatprep.mubr.msk.f32.mxu1 %vm294_vm1, %v556_v39 }
 0x2d8   : > { %v557_v40 = vpop.trf.xlu0 }
 0x2d9   : > { %1163 = vmatmul.mubr.msk.f32.gmra.mrb[18].mxu1 %vm294_vm1, %v557_v40 }
 0x2dc   : > { %v558_v41 = vpop.trf.xlu0 }
 0x2dd   : > { %1165 = vmatprep.mubr.msk.f32.mxu1 %vm294_vm1, %v558_v41 }
 0x2e0   : > { %v559_v42 = vpop.trf.xlu0 }
 0x2e1   : > { %1166 = vmatmul.mubr.msk.f32.gmra.mrb[20].mxu1 %vm294_vm1, %v559_v42 }
 0x37c   : > { %v1146_v43 = vpop.f32.mrb[6].mxu1 }
 0x37d   : > { %v754_v44 = vmul.f32 0.35355338, %v1146_v43  ;;  %v674_v45 = vpop.f32.mrb[7].mxu1 }
 0x37e   : > { %v753_v46 = vmul.f32 0.35355338, %v674_v45 }
 0x37f   : > { %771 = vmax.xlane.f32.xlu1 %v754_v44 }
 0x383   : > { %769 = vmax.xlane.f32.xlu1 %v753_v46 }
 0x384   : > { %v1149_v47 = vpop.f32.mrb[8].mxu1 }
 0x385   : > { %v684_v48 = vpop.f32.mrb[9].mxu1  ;;  %v756_v50 = vmul.f32 0.35355338, %v1149_v47 }
 0x386   : > { %v755_v49 = vmul.f32 0.35355338, %v684_v48 }
 0x388   : > { %773 = vmax.xlane.f32.xlu1 %v755_v49 }
 0x38c   : > { %775 = vmax.xlane.f32.xlu1 %v756_v50  ;;  %v1152_v51 = vpop.f32.mrb[10].mxu1 }
 0x38d   : > { %v758_v52 = vmul.f32 0.35355338, %v1152_v51  ;;  %v694_v53 = vpop.f32.mrb[11].mxu1 }
 0x38e   : > { %v757_v54 = vmul.f32 0.35355338, %v694_v53 }
 0x390   : > { %779 = vmax.xlane.f32.xlu1 %v758_v52  ;;  %777 = vmax.xlane.f32.xlu0 %v757_v54 }
 0x394   : > { %v1155_v55 = vpop.f32.mrb[12].mxu1 }
 0x395   : > { %v760_v56 = vmul.f32 0.35355338, %v1155_v55  ;;  %v704_v57 = vpop.f32.mrb[13].mxu1 }
 0x396   : > { %v1544_v58 = vmul.f32 0.35355338, %v704_v57  ;;  %v1405_v57 = vmov 0.0|0.0  }
 0x397   : > { %783 = vmax.xlane.f32.xlu1 %v760_v56  ;;  %1203 = vmatprep.subr.bf16.mxu0 %v1405_v57 }
 0x39b   : > { %781 = vmax.xlane.f32.xlu1 %v1544_v58 }
 0x39c   : > { %v1158_v59 = vpop.f32.mrb[14].mxu1 }
 0x39d   : > { %v1547_v60 = vmul.f32 0.35355338, %v1158_v59  ;;  %v714_v61 = vpop.f32.mrb[15].mxu1 }
 0x39e   : > { %v1550_v62 = vmul.f32 0.35355338, %v714_v61 }
 0x39f   : > { %787 = vmax.xlane.f32.xlu1 %v1547_v60 }
 0x3a3   : > { %785 = vmax.xlane.f32.xlu1 %v1550_v62 }
 0x3a4   : > { %v1161_v63 = vpop.f32.mrb[16].mxu1 }
 0x3a5   : > { %v1553_v1 = vmul.f32 0.35355338, %v1161_v63  ;;  %v724_v2 = vpop.f32.mrb[17].mxu1 }
 0x3a6   : > { %v1556_v3 = vmul.f32 0.35355338, %v724_v2 }
 0x3a7   : > { %791 = vmax.xlane.f32.xlu1 %v1553_v1 }
 0x3ab   : > { %789 = vmax.xlane.f32.xlu1 %v1556_v3 }
 0x3ac   : > { %v1164_v4 = vpop.f32.mrb[18].mxu1 }
 0x3ad   : > { %v1559_v5 = vmul.f32 0.35355338, %v1164_v4  ;;  %v734_v6 = vpop.f32.mrb[19].mxu1 }
 0x3ae   : > { %v1562_v7 = vmul.f32 0.35355338, %v734_v6 }
 0x3af   : > { %795 = vmax.xlane.f32.xlu1 %v1559_v5 }
 0x3b3   : > { %793 = vmax.xlane.f32.xlu1 %v1562_v7 }
 0x3b4   : > { %v1167_v8 = vpop.f32.mrb[20].mxu1 }
 0x3b5   : > { %v744_v9 = vpop.f32.mrb[21].mxu1  ;;  %v1567_v11 = vmul.f32 0.35355338, %v1167_v8 }
 0x3b6   : > { %v1565_v10 = vmul.f32 0.35355338, %v744_v9 }
 0x3b8   : > { %797 = vmax.xlane.f32.xlu1 %v1565_v10 }
 0x3bc   : > { %799 = vmax.xlane.f32.xlu1 %v1567_v11 }
 0x40c   : > { %v772_v12 = vpop.xlane.xlu1 %771 }
 0x40d   : > { %v802_v13 = vsub.f32 %v754_v44, %v772_v12 }
 0x40f   : > { %v819_v14 = vmul.f32 1.442695, %v802_v13 }
 0x410   : > { %v770_v15 = vpop.xlane.xlu1 %769 }
 0x411   : > { %1274 = vpow2.f32 %v819_v14  ;;  %v801_v16 = vsub.f32 %v753_v46, %v770_v15 }
 0x413   : > { %v817_v17 = vmul.f32 1.442695, %v801_v16 }
 0x415   : > { %1276 = vpow2.f32 %v817_v17  ;;  %v774_v18 = vpop.xlane.xlu1 %773 }
 0x416   : > { %v803_v20 = vsub.f32 %v755_v49, %v774_v18 }
 0x418   : > { %v821_v26 = vmul.f32 1.442695, %v803_v20 }
 0x419   : > { %v776_v19 = vpop.xlane.xlu1 %775 }
 0x41a   : > { %v804_v21 = vsub.f32 %v756_v50, %v776_v19 }
 0x41b   : > { %v1571_v22 = vpop.eup %1274 }
 0x41c   : > { %v823_v23 = vmul.f32 1.442695, %v804_v21  ;;  %851 = vadd.xlane.f32.xlu1 %v1571_v22 }
 0x41d   : > { %v780_v24 = vpop.xlane.xlu1 %779  ;;  %v778_v29 = vpop.xlane.xlu0 %777 }
 0x41e   : > { %1278 = vpow2.f32 %v823_v23  ;;  %v806_v27 = vsub.f32 %v758_v52, %v780_v24  ;;  %v805_v31 = vsub.f32 %v757_v54, %v778_v29 }
 0x41f   : > { %v1574_v28 = vpop.eup %1276  ;;  %1280 = vpow2.f32 %v821_v26 }
 0x420   : > { %849 = vadd.xlane.f32.xlu1 %v1574_v28  ;;  %v827_v30 = vmul.f32 1.442695, %v806_v27  ;;  %v825_v33 = vmul.f32 1.442695, %v805_v31 }
 0x422   : > { %1282 = vpow2.f32 %v827_v30 }
 0x423   : > { %1284 = vpow2.f32 %v825_v33 }
 0x424   : > { %v784_v32 = vpop.xlane.xlu1 %783 }
 0x425   : > { %v808_v34 = vsub.f32 %v760_v56, %v784_v32 }
 0x427   : > { %v831_v37 = vmul.f32 1.442695, %v808_v34 }
 0x428   : > { %v1577_v35 = vpop.eup %1278  ;;  %v782_v36 = vpop.xlane.xlu1 %781 }
 0x429   : > { %855 = vadd.xlane.f32.xlu1 %v1577_v35  ;;  %v807_v38 = vsub.f32 %v1544_v58, %v782_v36  ;;  %v1581_v39 = vpop.eup %1280  ;;  %1286 = vpow2.f32 %v831_v37 }
 0x42b   : > { %v829_v41 = vmul.f32 1.442695, %v807_v38 }
 0x42c   : > { %v788_v40 = vpop.xlane.xlu1 %787  ;;  %v1585_v43 = vpop.eup %1282 }
 0x42d   : > { %853 = vadd.xlane.f32.xlu1 %v1581_v39  ;;  %v810_v42 = vsub.f32 %v1547_v60, %v788_v40  ;;  %1288 = vpow2.f32 %v829_v41  ;;  %v1589_v47 = vpop.eup %1284 }
 0x42f   : > { %v835_v45 = vmul.f32 1.442695, %v810_v42 }
 0x430   : > { %v786_v44 = vpop.xlane.xlu1 %785 }
 0x431   : > { %859 = vadd.xlane.f32.xlu1 %v1585_v43  ;;  %v809_v46 = vsub.f32 %v1550_v62, %v786_v44  ;;  %1290 = vpow2.f32 %v835_v45 }
 0x433   : > { %v833_v49 = vmul.f32 1.442695, %v809_v46  ;;  %v1593_v51 = vpop.eup %1286 }
 0x434   : > { %v792_v48 = vpop.xlane.xlu1 %791 }
 0x435   : > { %857 = vadd.xlane.f32.xlu1 %v1589_v47  ;;  %v812_v50 = vsub.f32 %v1553_v1, %v792_v48  ;;  %1292 = vpow2.f32 %v833_v49 }
 0x437   : > { %v839_v53 = vmul.f32 1.442695, %v812_v50  ;;  %v1597_v55 = vpop.eup %1288 }
 0x438   : > { %v790_v52 = vpop.xlane.xlu1 %789 }
 0x439   : > { %863 = vadd.xlane.f32.xlu1 %v1593_v51  ;;  %v811_v54 = vsub.f32 %v1556_v3, %v790_v52  ;;  %1294 = vpow2.f32 %v839_v53 }
 0x43b   : > { %v837_v58 = vmul.f32 1.442695, %v811_v54  ;;  %v1602_v60 = vpop.eup %1290 }
 0x43c   : > { %v796_v56 = vpop.xlane.xlu1 %795 }
 0x43d   : > { %861 = vadd.xlane.f32.xlu1 %v1597_v55  ;;  %v814_v59 = vsub.f32 %v1559_v5, %v796_v56  ;;  %1296 = vpow2.f32 %v837_v58 }
 0x43f   : > { %v843_v62 = vmul.f32 1.442695, %v814_v59  ;;  %v1606_v1 = vpop.eup %1292 }
 0x440   : > { %v794_v61 = vpop.xlane.xlu1 %793 }
 0x441   : > { %867 = vadd.xlane.f32.xlu1 %v1602_v60  ;;  %v813_v63 = vsub.f32 %v1562_v7, %v794_v61  ;;  %1298 = vpow2.f32 %v843_v62 }
 0x443   : > { %v841_v3 = vmul.f32 1.442695, %v813_v63  ;;  %v1610_v6 = vpop.eup %1294 }
 0x445   : > { %865 = vadd.xlane.f32.xlu1 %v1606_v1  ;;  %v798_v2 = vpop.xlane.xlu1 %797  ;;  %1300 = vpow2.f32 %v841_v3 }
 0x446   : > { %v815_v4 = vsub.f32 %v1565_v10, %v798_v2 }
 0x447   : > { %v1614_v12 = vpop.eup %1296 }
 0x448   : > { %v845_v5 = vmul.f32 1.442695, %v815_v4 }
 0x449   : > { %871 = vadd.xlane.f32.xlu1 %v1610_v6  ;;  %v800_v8 = vpop.xlane.xlu1 %799 }
 0x44a   : > { %v816_v9 = vsub.f32 %v1567_v11, %v800_v8  ;;  %1302 = vpow2.f32 %v845_v5  ;;  %v449_v11 = vld [vmem:[%s1710_s6] sm:$0xff] }
 0x44b   : > { %v1617_v13 = vpop.eup %1298 }
 0x44c   : > { %v847_v7 = vmul.f32 1.442695, %v816_v9 }
 0x44d   : > { %869 = vadd.xlane.f32.xlu1 %v1614_v12 }
 0x44e   : > { %1304 = vpow2.f32 %v847_v7 }
 0x44f   : > { %v1620_v10 = vpop.eup %1300 }
 0x451   : > { %875 = vadd.xlane.f32.xlu1 %v1617_v13 }
 0x454   : > { %v1623_v14 = vpop.eup %1302 }
 0x455   : > { %873 = vadd.xlane.f32.xlu1 %v1620_v10 }
 0x458   : > { %v1625_v15 = vpop.eup %1304 }
 0x459   : > { %877 = vadd.xlane.f32.xlu1 %v1623_v14  ;;  %879 = vadd.xlane.f32.xlu0 %v1625_v15 }
 0x46a   : > { %452 = vperm.xlu1 %1270, %v449_v11  }
 0x4a9   : > { %v852_v16 = vpop.xlane.xlu1 %851 }
 0x4aa   : > { %1306 = vrcp.f32 %v852_v16 }
 0x4ad   : > { %v850_v17 = vpop.xlane.xlu1 %849 }
 0x4ae   : > { %1308 = vrcp.f32 %v850_v17 }
 0x4b4   : > { %v1307_v18 = vpop.eup %1306 }
 0x4b5   : > { %v898_v23 = vmul.f32 %v1307_v18, %v1571_v22 }
 0x4b6   : > { %v856_v19 = vpop.xlane.xlu1 %855 }
 0x4b7   : > { %1310 = vrcp.f32 %v856_v19 }
 0x4b8   : > { %v1309_v20 = vpop.eup %1308 }
 0x4b9   : > { %v897_v21 = vmul.f32 %v1309_v20, %v1574_v28 }
 0x4ba   : > { %v854_v24 = vpop.xlane.xlu1 %853 }
 0x4bb   : > { %1312 = vrcp.f32 %v854_v24  ;;  %v1204_v26 = vpack.c.bf16 %v898_v23, %v897_v21 }
 0x4bd   : > { %1205 = vmatpush3.bf16.xpose.msra.mxu0 %v1204_v26 }
 0x4be   : > { %v860_v27 = vpop.xlane.xlu1 %859  ;;  %1206 = vmatprep.subr.bf16.mxu0 %v1405_v57 }
 0x4bf   : > { %1314 = vrcp.f32 %v860_v27 }
 0x4c1   : > { %v1311_v30 = vpop.eup %1310 }
 0x4c2   : > { %v858_v29 = vpop.xlane.xlu1 %857  ;;  %v900_v34 = vmul.f32 %v1311_v30, %v1577_v35 }
 0x4c3   : > { %1316 = vrcp.f32 %v858_v29 }
 0x4c5   : > { %v1313_v31 = vpop.eup %1312 }
 0x4c6   : > { %v864_v32 = vpop.xlane.xlu1 %863  ;;  %v899_v33 = vmul.f32 %v1313_v31, %v1581_v39 }
 0x4c7   : > { %1318 = vrcp.f32 %v864_v32 }
 0x4c8   : > { %v1207_v28 = vpack.c.bf16 %v900_v34, %v899_v33 }
 0x4c9   : > { %v1315_v36 = vpop.eup %1314 }
 0x4ca   : > { %1208 = vmatpush3.bf16.xpose.msra.mxu0 %v1207_v28  ;;  %v862_v22 = vpop.xlane.xlu1 %861  ;;  %v902_v41 = vmul.f32 %v1315_v36, %v1585_v43 }
 0x4cb   : > { %1320 = vrcp.f32 %v862_v22  ;;  %1209 = vmatprep.subr.bf16.mxu0 %v1405_v57 }
 0x4cd   : > { %v1317_v37 = vpop.eup %1316 }
 0x4ce   : > { %v868_v38 = vpop.xlane.xlu1 %867  ;;  %v901_v40 = vmul.f32 %v1317_v37, %v1589_v47 }
 0x4cf   : > { %1322 = vrcp.f32 %v868_v38 }
 0x4d0   : > { %v1210_v42 = vpack.c.bf16 %v902_v41, %v901_v40 }
 0x4d1   : > { %v1319_v44 = vpop.eup %1318 }
 0x4d2   : > { %1211 = vmatpush3.bf16.xpose.msra.mxu0 %v1210_v42  ;;  %v866_v39 = vpop.xlane.xlu1 %865  ;;  %v904_v48 = vmul.f32 %v1319_v44, %v1593_v51 }
 0x4d3   : > { %1324 = vrcp.f32 %v866_v39  ;;  %1212 = vmatprep.subr.bf16.mxu0 %v1405_v57 }
 0x4d5   : > { %v1321_v35 = vpop.eup %1320 }
 0x4d6   : > { %v872_v45 = vpop.xlane.xlu1 %871  ;;  %v903_v46 = vmul.f32 %v1321_v35, %v1597_v55 }
 0x4d7   : > { %1326 = vrcp.f32 %v872_v45 }
 0x4d8   : > { %v1213_v49 = vpack.c.bf16 %v904_v48, %v903_v46 }
 0x4d9   : > { %v1323_v50 = vpop.eup %1322 }
 0x4da   : > { %1214 = vmatpush3.bf16.xpose.msra.mxu0 %v1213_v49  ;;  %v870_v47 = vpop.xlane.xlu1 %869  ;;  %v906_v54 = vmul.f32 %v1323_v50, %v1602_v60 }
 0x4db   : > { %1328 = vrcp.f32 %v870_v47  ;;  %1215 = vmatprep.subr.bf16.mxu0 %v1405_v57 }
 0x4dd   : > { %v1325_v43 = vpop.eup %1324 }
 0x4de   : > { %v876_v52 = vpop.xlane.xlu1 %875  ;;  %v905_v53 = vmul.f32 %v1325_v43, %v1606_v1 }
 0x4df   : > { %1330 = vrcp.f32 %v876_v52 }
 0x4e0   : > { %v1216_v56 = vpack.c.bf16 %v906_v54, %v905_v53 }
 0x4e1   : > { %v1327_v58 = vpop.eup %1326 }
 0x4e2   : > { %1217 = vmatpush3.bf16.xpose.msra.mxu0 %v1216_v56  ;;  %v874_v55 = vpop.xlane.xlu1 %873  ;;  %v908_v63 = vmul.f32 %v1327_v58, %v1610_v6 }
 0x4e3   : > { %1332 = vrcp.f32 %v874_v55  ;;  %1218 = vmatprep.subr.bf16.mxu0 %v1405_v57 }
 0x4e5   : > { %v1329_v51 = vpop.eup %1328 }
 0x4e6   : > { %v880_v59 = vpop.xlane.xlu0 %879  ;;  %v878_v61 = vpop.xlane.xlu1 %877  ;;  %v907_v62 = vmul.f32 %v1329_v51, %v1614_v12 }
 0x4e7   : > { %1334 = vrcp.f32 %v880_v59 }
 0x4e8   : > { %1336 = vrcp.f32 %v878_v61  ;;  %v1219_v1 = vpack.c.bf16 %v908_v63, %v907_v62 }
 0x4e9   : > { %v1331_v60 = vpop.eup %1330 }
 0x4ea   : > { %1220 = vmatpush3.bf16.xpose.msra.mxu0 %v1219_v1  ;;  %v910_v4 = vmul.f32 %v1331_v60, %v1617_v13  ;;  %v453_v11 = vpop.permute.xlu1 %452 }
 0x4eb   : > { %1221 = vmatprep.subr.bf16.mxu0 %v1405_v57  ;;  %v525_v16 = vadd.f32 %v1526_v25, %v453_v11 }
 0x4ed   : > { %v1333_v2 = vpop.eup %1332 }
 0x4ee   : > { %v909_v3 = vmul.f32 %v1333_v2, %v1620_v10 }
 0x4f0   : > { %v1222_v5 = vpack.c.bf16 %v910_v4, %v909_v3 }
 0x4f1   : > { %v1335_v8 = vpop.eup %1334 }
 0x4f2   : > { %v1337_v9 = vpop.eup %1336  ;;  %1223 = vmatpush3.bf16.xpose.msra.mxu0 %v1222_v5  ;;  %v912_v12 = vmul.f32 %v1335_v8, %v1625_v15 }
 0x4f3   : > { %1224 = vmatprep.subr.bf16.mxu0 %v1405_v57  ;;  %v911_v6 = vmul.f32 %v1337_v9, %v1623_v14 }
 0x4f5   : > { %v1225_v7 = vpack.c.bf16 %v912_v12, %v911_v6 }
 0x4fa   : > { %1226 = vmatpush3.bf16.xpose.msra.mxu0 %v1225_v7 }
 0x501   : > { %1201 = vmatmul.mubr.f32.vlgmr.msra.gmra.mrb[0].mxu0 %v525_v16 }
 0x5d4   : > { %v979_v13 = vpop.f32.mrb[0].mxu0 }
 0x5d5   : > { %v983_v10 = vadd.f32 %v979_v13, %v1500_v0  ;;  %v1202_v57 = vpop.f32.mrb[1].mxu0 }
 0x5d7   : > { %984 = vst [vmem:[%s269_s19] sm:$0xff] %v983_v10 }
 0x5d8   : > { %1351 = shalt.err (!%p1348_p3)
}
 0x5d9   : > { %s1352_s14 = scalar_lea.hbm %s1662_s23, 128  ;;  %s1356_s17 = scalar_lea.hbm %s1711_s7, 256 }
 0x5da   : > { %p1353_p4 = scmp.ne.s32.totalorder %s1662_s23, %s1352_s14  ;;  %p1357_p9 = scmp.lt.u32.totalorder %s1662_s23, %s1711_s7 }
 0x5db   : > { %p1358_p10 = scmp.lt.u32.totalorder %s1356_s17, %s1352_s14  ;;  %p1360_p12 = scmp.lt.u32.totalorder %s1352_s14, %s1662_s23 }
 0x5dc   : > { %p1354_p7 = pnand %p1353_p4, %p1485_p5 }
 0x5dd   : > { %p1359_p11 = por %p1358_p10, %p1357_p9 }
 0x5de   : > { %p1355_p8 = pneg %p1354_p7 }
 0x5df   : > { %p1361_p13 = por %p1360_p12, %p1359_p11 }
 0x5e1   : > { %p1362_p0 = pnand %p1361_p13, %p1355_p8 }
 0x5e3   : > { %1365 = shalt.err (!%p1362_p0)
}
 0x5e4   : > { %1227 = dma.vmem_to_hbm [thread:$0]  (%p1485_p5), %s1664_s20, 128, %s1662_s23, %s986_s29  }
 0x5e5 PF: > { %p1233_p1 = scmp.ge.s32.totalorder %s1400_s27, 2  ;;  %s1011_s21 = sand.u32 1, %s1388_s24  }
 0x5e6   : > { %s1012_s22 = scalar_lea.sflag [#allocation3], %s1011_s21 }
 0x5e7   : > { %p1230_p2 = pnand %p1233_p1, %p1489_p6 }
 0x5e9   : > { %1383 = dma.done.wait (!%p1230_p2), %s1012_s22, 128  }
 0x5ea   : > { %1385 = vsyncadd (!%p1230_p2), %s1012_s22, 4294967168  ;;  %p17_p3 = scmp.ge.s32.totalorder %s1472_s30, 4   ;;  %s1714_s24 = smov %s1392_s25 }
 0x5eb   : > { %s1715_s25 = smov %s1396_s26  ;;  %s1716_s26 = smov %s1483_s10 }
 0x5ec   : > { %s1717_s27 = smov %s1472_s30  ;;  %19 = sbr.rel (!%p17_p3) target bundleno = 3 (0x3), region = 83 }
 0x5f3   :  { %1017 = vsyncpa [#allocation3], 1 }
 0x5f4   :  { %1019 = vsyncpa [#allocation3 + $0x1], 1 }

</bundles_post_ra>
